<compile_context>
chip_gen: v5e
topology: v5e:2x2
jax: 0.10.0
libtpu: 0.0.40
codegen_flags: <defaults>
</compile_context>

<pallas_src>
import jax
import jax.numpy as jnp
from jax.experimental import pallas as pl
from jax.experimental.pallas import tpu as pltpu

_LANE = 128
_SUBLANE = 8


def _round_up(x, m):
    return ((x + m - 1) // m) * m


def _net_kernel(x_ref, w1_ref, b1_ref, w2_ref, b2_ref, o_ref):
    # Linear 1 + ReLU (hidden axis lane-padded to a multiple of 128; padded
    # columns of w1/b1 are zero, so padded hidden lanes are ReLU(0) = 0).
    x = x_ref[...]
    h = jnp.dot(x, w1_ref[...], preferred_element_type=jnp.float32) + b1_ref[...]
    h = jnp.maximum(h, 0.0)

    # Linear 2 (action axis lane-padded to 128; padded lanes carry bias -1e30
    # so exp underflows to 0 and they drop out of the softmax).
    logits = jnp.dot(h, w2_ref[...], preferred_element_type=jnp.float32) + b2_ref[...]

    # Numerically stable softmax over dim=1 (last axis here).
    m = jnp.max(logits, axis=-1, keepdims=True)
    e = jnp.exp(logits - m)
    denom = jnp.sum(e, axis=-1, keepdims=True)
    o_ref[...] = (e * pl.reciprocal(denom, approx=True)).astype(o_ref.dtype)


def net_forward(x, w1, b1, w2, b2, *, block_b=1024):
    """Pallas implementation of Net.forward."""
    B, obs_size = x.shape
    hidden = w1.shape[1]
    n_actions = w2.shape[1]

    # Lane-dense intermediate: pad the hidden axis to a multiple of 128.
    h_pad = _round_up(max(hidden, 1), _LANE)
    w1p = jnp.pad(w1, ((0, 0), (0, h_pad - hidden)))
    b1p = jnp.pad(b1, ((0, 0), (0, h_pad - hidden)))

    # Lane-dense output: pad the action axis to a multiple of 128.
    n_pad = _round_up(max(n_actions, 1), _LANE)
    w2p = jnp.pad(w2, ((0, h_pad - hidden), (0, n_pad - n_actions)))
    b2p = jnp.pad(b2, ((0, 0), (0, n_pad - n_actions)), constant_values=-1e30)

    # Batch tiling: biggest sublane-aligned tile up to block_b; pad B to a
    # multiple of the tile so the grid divides evenly.
    tb = min(_round_up(B, _SUBLANE), _round_up(block_b, _SUBLANE))
    b_padded = _round_up(B, tb)
    if b_padded != B:
        x = jnp.pad(x, ((0, b_padded - B), (0, 0)))
    grid = (b_padded // tb,)

    cost = pl.CostEstimate(
        flops=2 * b_padded * (obs_size * h_pad + h_pad * n_pad),
        transcendentals=2 * b_padded * n_pad,  # exp + approx reciprocal
        bytes_accessed=4 * (b_padded * obs_size + w1p.size + b1p.size
                            + w2p.size + b2p.size + b_padded * n_pad),
    )

    out = pl.pallas_call(
        _net_kernel,
        out_shape=jax.ShapeDtypeStruct((b_padded, n_pad), jnp.float32),
        grid=grid,
        in_specs=[
            pl.BlockSpec((tb, obs_size), lambda i: (i, 0)),     # x: tiled over batch
            pl.BlockSpec((obs_size, h_pad), lambda i: (0, 0)),  # w1 (padded): resident
            pl.BlockSpec((1, h_pad), lambda i: (0, 0)),         # b1 (padded): resident
            pl.BlockSpec((h_pad, n_pad), lambda i: (0, 0)),     # w2 (padded): resident
            pl.BlockSpec((1, n_pad), lambda i: (0, 0)),         # b2 (padded): resident
        ],
        out_specs=pl.BlockSpec((tb, n_pad), lambda i: (i, 0)),
        compiler_params=pltpu.CompilerParams(
            dimension_semantics=("parallel",),  # independent batch tiles -> dual-TC on v7x
        ),
        cost_estimate=cost,
    )(x, w1p, b1p, w2p, b2p)

    # Strip batch padding and the lane padding of the action axis.
    return out[:B, :n_actions]


def init_params(key, obs_size, hidden_size, n_actions):
    """PyTorch-style uniform(-1/sqrt(fan_in), 1/sqrt(fan_in)) init (deterministic)."""
    k1, k2, k3, k4 = jax.random.split(key, 4)
    lim1 = 1.0 / jnp.sqrt(jnp.float32(obs_size))
    lim2 = 1.0 / jnp.sqrt(jnp.float32(hidden_size))
    w1 = jax.random.uniform(k1, (obs_size, hidden_size), jnp.float32, -lim1, lim1)
    b1 = jax.random.uniform(k2, (1, hidden_size), jnp.float32, -lim1, lim1)
    w2 = jax.random.uniform(k3, (hidden_size, n_actions), jnp.float32, -lim2, lim2)
    b2 = jax.random.uniform(k4, (1, n_actions), jnp.float32, -lim2, lim2)
    return w1, b1, w2, b2


if __name__ == "__main__":
    obs_size, hidden_size, n_actions = 8, 32, 4
    batch = 1000  # non-multiple of the tile -> exercises batch padding + multi-step grid

    key = jax.random.PRNGKey(0)
    kx, kp = jax.random.split(key)
    x = jax.random.normal(kx, (batch, obs_size), dtype=jnp.float32)
    w1, b1, w2, b2 = init_params(kp, obs_size, hidden_size, n_actions)

    out = net_forward(x, w1, b1, w2, b2, block_b=256)
    jax.block_until_ready(out)

    # Plain-JAX reference
    h_ref = jnp.maximum(x @ w1 + b1, 0.0)
    logits_ref = h_ref @ w2 + b2
    ref = jax.nn.softmax(logits_ref, axis=1)

    assert out.shape == (batch, n_actions)
    assert jnp.allclose(out, ref, atol=1e-4, rtol=1e-4), "mismatch vs reference"
    assert jnp.allclose(jnp.sum(out, axis=1), 1.0, atol=1e-4)

    print("KERNEL_OK")
</pallas_src>

<mosaic_0001>
module attributes {stable_mosaic.version = 11 : i64} {
  func.func @_net_kernel(%arg0: i32, %arg1: memref<256x8xf32, #tpu.memory_space<vmem>>, %arg2: memref<8x128xf32, #tpu.memory_space<vmem>>, %arg3: memref<1x128xf32, #tpu.memory_space<vmem>>, %arg4: memref<128x128xf32, #tpu.memory_space<vmem>>, %arg5: memref<1x128xf32, #tpu.memory_space<vmem>>, %arg6: memref<256x128xf32, #tpu.memory_space<vmem>>) attributes {dimension_semantics = [#tpu.dimension_semantics<parallel>], iteration_bounds = array<i64: 4>, scalar_prefetch = 0 : i64, scratch_operands = 0 : i64, tpu.core_type = #tpu.core_type<tc>, window_params = [{transform_indices = @transform_0, window_bounds = array<i64: 256, 8>}, {pipeline_mode = #tpu.pipeline_mode<synchronous>, transform_indices = @transform_1, window_bounds = array<i64: 8, 128>}, {pipeline_mode = #tpu.pipeline_mode<synchronous>, transform_indices = @transform_2, window_bounds = array<i64: 1, 128>}, {pipeline_mode = #tpu.pipeline_mode<synchronous>, transform_indices = @transform_3, window_bounds = array<i64: 128, 128>}, {pipeline_mode = #tpu.pipeline_mode<synchronous>, transform_indices = @transform_4, window_bounds = array<i64: 1, 128>}, {transform_indices = @transform_5, window_bounds = array<i64: 256, 128>}]} {
    %c0 = arith.constant 0 : index
    %c0_0 = arith.constant 0 : index
    %0 = vector.load %arg1[%c0, %c0_0] : memref<256x8xf32, #tpu.memory_space<vmem>>, vector<256x8xf32>
    %c0_1 = arith.constant 0 : index
    %c0_2 = arith.constant 0 : index
    %1 = vector.load %arg2[%c0_1, %c0_2] : memref<8x128xf32, #tpu.memory_space<vmem>>, vector<8x128xf32>
    %cst = arith.constant dense<0.000000e+00> : vector<256x128xf32>
    %2 = tpu.matmul %0, %1, %cst {dimension_numbers = #tpu.dot_dimension_numbers<[1], [0], [0], [1], [0, 0, 1, 1], [], []>} : vector<256x8xf32>, vector<8x128xf32>, vector<256x128xf32> -> vector<256x128xf32>
    %c0_3 = arith.constant 0 : index
    %c0_4 = arith.constant 0 : index
    %3 = vector.load %arg3[%c0_3, %c0_4] : memref<1x128xf32, #tpu.memory_space<vmem>>, vector<1x128xf32>
    %4 = vector.broadcast %3 : vector<1x128xf32> to vector<256x128xf32>
    %5 = arith.addf %2, %4 : vector<256x128xf32>
    %cst_5 = arith.constant 0.000000e+00 : f32
    %6 = vector.broadcast %cst_5 : f32 to vector<256x128xf32>
    %7 = arith.maximumf %5, %6 : vector<256x128xf32>
    %c0_6 = arith.constant 0 : index
    %c0_7 = arith.constant 0 : index
    %8 = vector.load %arg4[%c0_6, %c0_7] : memref<128x128xf32, #tpu.memory_space<vmem>>, vector<128x128xf32>
    %cst_8 = arith.constant dense<0.000000e+00> : vector<256x128xf32>
    %9 = tpu.matmul %7, %8, %cst_8 {dimension_numbers = #tpu.dot_dimension_numbers<[1], [0], [0], [1], [0, 0, 1, 1], [], []>} : vector<256x128xf32>, vector<128x128xf32>, vector<256x128xf32> -> vector<256x128xf32>
    %c0_9 = arith.constant 0 : index
    %c0_10 = arith.constant 0 : index
    %10 = vector.load %arg5[%c0_9, %c0_10] : memref<1x128xf32, #tpu.memory_space<vmem>>, vector<1x128xf32>
    %11 = vector.broadcast %10 : vector<1x128xf32> to vector<256x128xf32>
    %12 = arith.addf %9, %11 : vector<256x128xf32>
    %cst_11 = arith.constant dense<0xFF800000> : vector<256xf32>
    %13 = vector.multi_reduction <maximumf>, %12, %cst_11 [1] : vector<256x128xf32> to vector<256xf32>
    %14 = vector.shape_cast %13 : vector<256xf32> to vector<256x1xf32>
    %15 = vector.broadcast %14 : vector<256x1xf32> to vector<256x128xf32>
    %16 = arith.subf %12, %15 : vector<256x128xf32>
    %17 = math.exp %16 : vector<256x128xf32>
    %cst_12 = arith.constant dense<0.000000e+00> : vector<256xf32>
    %18 = vector.multi_reduction <add>, %17, %cst_12 [1] : vector<256x128xf32> to vector<256xf32>
    %19 = vector.shape_cast %18 : vector<256xf32> to vector<256x1xf32>
    %20 = tpu.reciprocal %19 {approx = true} : vector<256x1xf32> -> vector<256x1xf32>
    %21 = vector.broadcast %20 : vector<256x1xf32> to vector<256x128xf32>
    %22 = arith.mulf %17, %21 : vector<256x128xf32>
    %c0_13 = arith.constant 0 : index
    %c0_14 = arith.constant 0 : index
    %23 = vector.load %arg6[%c0_13, %c0_14] : memref<256x128xf32, #tpu.memory_space<vmem>>, vector<256x128xf32>
    tpu.vector_store %arg6[%c0_13, %c0_14], %22 {strides = array<i32>} : memref<256x128xf32, #tpu.memory_space<vmem>>, vector<256x128xf32>,
    return
  }
  func.func @transform_0(%arg0: i32) -> (i32, i32) {
    %c0_i32 = arith.constant 0 : i32
    %c0_i32_0 = arith.constant 0 : i32
    return %arg0, %c0_i32 : i32, i32
  }
  func.func @transform_1(%arg0: i32) -> (i32, i32) {
    %c0_i32 = arith.constant 0 : i32
    %c0_i32_0 = arith.constant 0 : i32
    %c0_i32_1 = arith.constant 0 : i32
    return %c0_i32, %c0_i32_0 : i32, i32
  }
  func.func @transform_2(%arg0: i32) -> (i32, i32) {
    %c0_i32 = arith.constant 0 : i32
    %c0_i32_0 = arith.constant 0 : i32
    %c0_i32_1 = arith.constant 0 : i32
    return %c0_i32, %c0_i32_0 : i32, i32
  }
  func.func @transform_3(%arg0: i32) -> (i32, i32) {
    %c0_i32 = arith.constant 0 : i32
    %c0_i32_0 = arith.constant 0 : i32
    %c0_i32_1 = arith.constant 0 : i32
    return %c0_i32, %c0_i32_0 : i32, i32
  }
  func.func @transform_4(%arg0: i32) -> (i32, i32) {
    %c0_i32 = arith.constant 0 : i32
    %c0_i32_0 = arith.constant 0 : i32
    %c0_i32_1 = arith.constant 0 : i32
    return %c0_i32, %c0_i32_0 : i32, i32
  }
  func.func @transform_5(%arg0: i32) -> (i32, i32) {
    %c0_i32 = arith.constant 0 : i32
    %c0_i32_0 = arith.constant 0 : i32
    return %arg0, %c0_i32 : i32, i32
  }
}

</mosaic_0001>

<bundles_post_ra>
// kernel: tpu_custom_call.1
= control target key start
LH: loop header
LB: loop body
LE: loop exit
PB: predicated region body
PF: predicated region fallthrough
CT: control target
= control target key end

     0   :  { %10 = vsyncpa [#allocation3], 0  ;;  %s1993_s0 = inlined_call_operand.vmem [shape: f32[1024,8], index: 0, kind: input, shape index: {}]   ;;  %s1994_s1 = inlined_call_operand.vmem [shape: f32[8,128], index: 1, kind: input, shape index: {}]   ;;  %s1995_s2 = inlined_call_operand.vmem [shape: f32[1,128], index: 2, kind: input, shape index: {}]   ;;  %s1996_s3 = inlined_call_operand.vmem [shape: f32[128,128], index: 3, kind: input, shape index: {}]   ;;  %s1997_s4 = inlined_call_operand.vmem [shape: f32[1,128], index: 4, kind: input, shape index: {}]   ;;  %s1998_s5 = inlined_call_operand.hbm [shape: f32[1024,128], index: 5, kind: output, shape index: {}]  }
   0x1   :  { %12 = vsyncpa [#allocation3 + $0x1], 0  ;;  %s1381_s18 = smov 0   ;;  %s1383_s19 = smov 0  }
   0x2   :  { %s1385_s20 = smov 0   ;;  %s1387_s21 = smov 0  }
   0x3 LB: > { %s1402_s22 = sadd.s32 4294967295, %s1347_s21   ;;  %s1036_s23 = sadd.s32 4294967294, %s1347_s21   ;;  %s1347_s21 = sphi %s1387_s21, %s2004_s21   ;;  %s1343_s20 = sphi %s1385_s20, %s2003_s20   ;;  %s1339_s19 = sphi %s1383_s19, %s2002_s19   ;;  %s1335_s18 = sphi %s1381_s18, %s2001_s18  }
   0x4   : > { %s1406_s24 = sadd.s32 1, %s1347_s21   ;;  %s135_s25 = sadd.s32 1, %s1343_s20 }
   0x5   : > { %s132_s26 = ssub.s32 %s1347_s21, %s1406_s24  ;;  %p145_p0 = scmp.ne.s32.totalorder %s1343_s20, %s1339_s19 }
   0x6   : > { %p133_p1 = scmp.eq.s32.totalorder %s132_s26, 0  ;;  %p146_p2 = scmp.eq.s32.totalorder %s1402_s22, 3 }
   0x7   : > { %p151_p3 = scmp.ne.s32.totalorder %s1339_s19, %s1335_s18  ;;  %p152_p4 = scmp.eq.s32.totalorder %s1036_s23, 3 }
   0x8   : > { %s1417_s27 = scalar_select %p133_p1, %s1343_s20, %s135_s25  }
   0x9   : > { %p1419_p5 = por %p146_p2, %p145_p0  ;;  %p1423_p6 = por %p152_p4, %p151_p3 }
   0xa   : > { %p1039_p7 = scmp.ge.s32.totalorder %s1347_s21, 1  ;;  %p191_p8 = scmp.lt.s32.totalorder %s1347_s21, 5 }
   0xc   : > { %p192_p9 = pnand %p1039_p7, %p191_p8 }
   0xd   : > { %s1041_s7 = sshll.u32 (!%p192_p9), %s1402_s22, 5  ;;  %s216_s17 = sand.u32 (!%p192_p9), 1, %s1339_s19  }
   0xe   : > { %195 = sbr.rel (%p192_p9) target bundleno = 776 (0x308), region = 40  ;;  %p220_p10 = scmp.lt.s32.totalorder (!%p192_p9), %s1041_s7, 127 }
   0xf   : > { %s1040_s23 = sshll.u32 (!%p192_p9), %s216_s17, 8  ;;  %s1080_s26 = sshll.u32 (!%p192_p9), %s1402_s22, 8 }
  0x10   : > { %s1827_s25 = scalar_lea.vmem (!%p192_p9), [#allocation2], %s1040_s23  ;;  %s959_s22 = scalar_lea.sflag (!%p192_p9), [#allocation3], %s216_s17 }
  0x11   : > { %s1305_s15 = scalar_lea.hbm (!%p192_p9), %s1998_s5, 1024 }
  0x13   : > { %v258_v0 = vld [vmem:[%s1994_s1] sm:$0xff]  ;;  %s2006_s7 = smov (!%p220_p10, %s1041_s7), 127  ;;  %vm263_vm0 = vcmask 64512   ;;  %v520_v19 = vld [vmem:[%s1996_s3 + $0x78] sm:$0xff]  ;;  %v519_v20 = vld [vmem:[%s1996_s3 + $0x70] sm:$0xff] }
  0x14   : > { %375 = vmatpush.msra.mxu0 %v258_v0  ;;  %1081 = vmatpush.msra.mxu3 %v258_v0  ;;  %s1042_s8 = sshll.u32 %s2006_s7, 3  ;;  %v518_v21 = vld [vmem:[%s1996_s3 + $0x68] sm:$0xff]  ;;  %v517_v24 = vld [vmem:[%s1996_s3 + $0x60] sm:$0xff]  ;;  %v516_v25 = vld [vmem:[%s1996_s3 + $0x58] sm:$0xff]  ;;  %s970_s7 = scalar_lea.hbm %s1998_s5, %s1080_s26 }
  0x15   : > { %s1436_s11 = scalar_lea.vmem %s1993_s0, %s1042_s8  ;;  %525 = vmatpush.msra.mxu1 %v520_v19  ;;  %1082 = vmatpush.msra.mxu2 %v520_v19  ;;  %v515_v26 = vld [vmem:[%s1996_s3 + $0x50] sm:$0xff]  ;;  %v514_v27 = vld [vmem:[%s1996_s3 + $0x48] sm:$0xff]  ;;  %v513_v30 = vld [vmem:[%s1996_s3 + $0x40] sm:$0xff]  ;;  %s971_s8 = sshll.u32 %s1827_s25, 4  ;;  %s972_s8 = int_to_ptr.vmem [resolvable:$true] %s971_s8 }
  0x16   : > { %v226_v1 = vld [vmem:[%s1436_s11] sm:$0xff]  ;;  %v244_v2 = vld [vmem:[%s1436_s11 + $0x90] sm:$0xff]  ;;  %v227_v3 = vld [vmem:[%s1436_s11 + $0x8] sm:$0xff]  ;;  %1083 = vmatpush.msrb.mxu3 %v520_v19  ;;  %s973_s9 = sshll.u32 %s970_s7, 4  ;;  %s974_s9 = int_to_ptr.hbm [resolvable:$true] %s973_s9 }
  0x17   : > { %1043 = vmatmul.msk.f32.vlgmr.msra.gmra.mxu0 %vm263_vm0, %v226_v1  ;;  %1061 = vmatmul.msk.f32.vlgmr.msra.gmra.mxu3 %vm263_vm0, %v244_v2  ;;  %v245_v4 = vld [vmem:[%s1436_s11 + $0x98] sm:$0xff]  ;;  %v228_v5 = vld [vmem:[%s1436_s11 + $0x10] sm:$0xff]  ;;  %v246_v6 = vld [vmem:[%s1436_s11 + $0xa0] sm:$0xff]  ;;  %s1299_s10 = sshra.s32 %s974_s9, 4  ;;  %s1300_s10 = int_to_ptr.hbm [resolvable:$true] %s1299_s10 }
  0x18   : > { %v229_v7 = vld [vmem:[%s1436_s11 + $0x18] sm:$0xff]  ;;  %v247_v8 = vld [vmem:[%s1436_s11 + $0xa8] sm:$0xff]  ;;  %v230_v9 = vld [vmem:[%s1436_s11 + $0x20] sm:$0xff]  ;;  %526 = vmatpush.msra.mxu1 %v519_v20  ;;  %1085 = vmatpush.msrb.mxu3 %v519_v20  ;;  %s1301_s12 = scalar_lea.hbm %s1300_s10, 256  ;;  %p1306_p0 = scmp.lt.s32.totalorder %s1300_s10, %s1998_s5 }
  0x19   : > { %v248_v10 = vld [vmem:[%s1436_s11 + $0xb0] sm:$0xff]  ;;  %v231_v11 = vld [vmem:[%s1436_s11 + $0x28] sm:$0xff]  ;;  %v249_v12 = vld [vmem:[%s1436_s11 + $0xb8] sm:$0xff]  ;;  %1084 = vmatpush.msra.mxu2 %v519_v20  ;;  %p1302_p11 = scmp.ne.s32.totalorder %s1300_s10, %s1301_s12  ;;  %p1307_p1 = scmp.lt.s32.totalorder %s1305_s15, %s1301_s12 }
  0x1a   : > { %v232_v13 = vld [vmem:[%s1436_s11 + $0x30] sm:$0xff]  ;;  %v250_v14 = vld [vmem:[%s1436_s11 + $0xc0] sm:$0xff]  ;;  %v233_v15 = vld [vmem:[%s1436_s11 + $0x38] sm:$0xff]  ;;  %527 = vmatpush.msra.mxu1 %v518_v21  ;;  %1087 = vmatpush.msrb.mxu3 %v518_v21 }
  0x1b   : > { %v251_v16 = vld [vmem:[%s1436_s11 + $0xc8] sm:$0xff]  ;;  %v234_v17 = vld [vmem:[%s1436_s11 + $0x40] sm:$0xff]  ;;  %v252_v18 = vld [vmem:[%s1436_s11 + $0xd0] sm:$0xff]  ;;  %1086 = vmatpush.msra.mxu2 %v518_v21  ;;  %p1303_p12 = pnand %p1302_p11, %p1419_p5  ;;  %p1308_p2 = por %p1307_p1, %p1306_p0 }
  0x1c   : > { %v235_v22 = vld [vmem:[%s1436_s11 + $0x48] sm:$0xff]  ;;  %v253_v23 = vld [vmem:[%s1436_s11 + $0xd8] sm:$0xff]  ;;  %528 = vmatpush.msra.mxu1 %v517_v24  ;;  %1089 = vmatpush.msrb.mxu3 %v517_v24  ;;  %v236_v28 = vld [vmem:[%s1436_s11 + $0x50] sm:$0xff] }
  0x1d   : > { %1088 = vmatpush.msra.mxu2 %v517_v24  ;;  %v254_v29 = vld [vmem:[%s1436_s11 + $0xe0] sm:$0xff]  ;;  %v512_v31 = vld [vmem:[%s1996_s3 + $0x38] sm:$0xff]  ;;  %v511_v32 = vld [vmem:[%s1996_s3 + $0x30] sm:$0xff]  ;;  %p1304_p13 = pneg %p1303_p12 }
  0x1e   : > { %529 = vmatpush.msra.mxu1 %v516_v25  ;;  %1091 = vmatpush.msrb.mxu3 %v516_v25  ;;  %v510_v33 = vld [vmem:[%s1996_s3 + $0x28] sm:$0xff]  ;;  %v237_v34 = vld [vmem:[%s1436_s11 + $0x58] sm:$0xff]  ;;  %v509_v36 = vld [vmem:[%s1996_s3 + $0x20] sm:$0xff] }
  0x1f   : > { %1044 = vmatmul.msk.f32.gmra.mxu0 %vm263_vm0, %v227_v3  ;;  %1062 = vmatmul.msk.f32.gmra.mxu3 %vm263_vm0, %v245_v4  ;;  %v255_v35 = vld [vmem:[%s1436_s11 + $0xe8] sm:$0xff]  ;;  %v508_v37 = vld [vmem:[%s1996_s3 + $0x18] sm:$0xff]  ;;  %v507_v38 = vld [vmem:[%s1996_s3 + $0x10] sm:$0xff]  ;;  %p1309_p3 = pnand %p1308_p2, %p1304_p13 }
  0x20   : > { %1090 = vmatpush.msra.mxu2 %v516_v25  ;;  %530 = vmatpush.msra.mxu1 %v515_v26  ;;  %v238_v39 = vld [vmem:[%s1436_s11 + $0x60] sm:$0xff]  ;;  %v256_v40 = vld [vmem:[%s1436_s11 + $0xf0] sm:$0xff]  ;;  %v506_v41 = vld [vmem:[%s1996_s3 + $0x8] sm:$0xff] }
  0x21   : > { %1093 = vmatpush.msrb.mxu3 %v515_v26  ;;  %v505_v42 = vld [vmem:[%s1996_s3] sm:$0xff]  ;;  %v239_v43 = vld [vmem:[%s1436_s11 + $0x68] sm:$0xff]  ;;  %v257_v44 = vld [vmem:[%s1436_s11 + $0xf8] sm:$0xff] }
  0x22   : > { %1092 = vmatpush.msra.mxu2 %v515_v26  ;;  %531 = vmatpush.msra.mxu1 %v514_v27  ;;  %v240_v45 = vld [vmem:[%s1436_s11 + $0x70] sm:$0xff]  ;;  %v241_v46 = vld [vmem:[%s1436_s11 + $0x78] sm:$0xff]  ;;  %v1549_v47 = vld [vmem:[%s1995_s2] ss:$0 sm:$0xff] }
  0x23   : > { %1095 = vmatpush.msrb.mxu3 %v514_v27  ;;  %v242_v49 = vld [vmem:[%s1436_s11 + $0x80] sm:$0xff]  ;;  %v243_v54 = vld [vmem:[%s1436_s11 + $0x88] sm:$0xff] }
  0x24   : > { %532 = vmatpush.msra.mxu1 %v513_v30  ;;  %1094 = vmatpush.msra.mxu2 %v514_v27 }
  0x25   : > { %1097 = vmatpush.msrb.mxu3 %v513_v30 }
  0x26   : > { %533 = vmatpush.msra.mxu1 %v512_v31  ;;  %1096 = vmatpush.msra.mxu2 %v513_v30 }
  0x27   : > { %1045 = vmatmul.msk.f32.gmra.mxu0 %vm263_vm0, %v228_v5  ;;  %1063 = vmatmul.msk.f32.gmra.mxu3 %vm263_vm0, %v246_v6 }
  0x28   : > { %1099 = vmatpush.msrb.mxu3 %v512_v31  ;;  %534 = vmatpush.msra.mxu1 %v511_v32 }
  0x29   : > { %1098 = vmatpush.msra.mxu2 %v512_v31 }
  0x2a   : > { %1101 = vmatpush.msrb.mxu3 %v511_v32  ;;  %535 = vmatpush.msra.mxu1 %v510_v33 }
  0x2b   : > { %1100 = vmatpush.msra.mxu2 %v511_v32 }
  0x2c   : > { %1103 = vmatpush.msrb.mxu3 %v510_v33  ;;  %536 = vmatpush.msra.mxu1 %v509_v36 }
  0x2d   : > { %1102 = vmatpush.msra.mxu2 %v510_v33 }
  0x2e   : > { %1105 = vmatpush.msrb.mxu3 %v509_v36  ;;  %537 = vmatpush.msra.mxu1 %v508_v37 }
  0x2f   : > { %1046 = vmatmul.msk.f32.gmra.mxu0 %vm263_vm0, %v229_v7  ;;  %1064 = vmatmul.msk.f32.gmra.mxu3 %vm263_vm0, %v247_v8 }
  0x30   : > { %1107 = vmatpush.msrb.mxu3 %v508_v37  ;;  %538 = vmatpush.msra.mxu1 %v507_v38 }
  0x31   : > { %1104 = vmatpush.msra.mxu2 %v509_v36 }
  0x32   : > { %1109 = vmatpush.msrb.mxu3 %v507_v38  ;;  %539 = vmatpush.msra.mxu1 %v506_v41 }
  0x33   : > { %1106 = vmatpush.msra.mxu2 %v508_v37 }
  0x34   : > { %1111 = vmatpush.msrb.mxu3 %v506_v41  ;;  %540 = vmatpush.msra.mxu1 %v505_v42 }
  0x35   : > { %1108 = vmatpush.msra.mxu2 %v507_v38 }
  0x36   : > { %1113 = vmatpush.msrb.mxu3 %v505_v42 }
  0x37   : > { %1047 = vmatmul.msk.f32.gmra.mxu0 %vm263_vm0, %v230_v9  ;;  %1065 = vmatmul.msk.f32.gmra.mxu3 %vm263_vm0, %v248_v10 }
  0x38   : > { %1110 = vmatpush.msra.mxu2 %v506_v41 }
  0x3a   : > { %1112 = vmatpush.msra.mxu2 %v505_v42 }
  0x3f   : > { %1048 = vmatmul.msk.f32.gmra.mxu0 %vm263_vm0, %v231_v11  ;;  %1066 = vmatmul.msk.f32.gmra.mxu3 %vm263_vm0, %v249_v12 }
  0x47   : > { %1049 = vmatmul.msk.f32.gmra.mxu0 %vm263_vm0, %v232_v13  ;;  %1067 = vmatmul.msk.f32.gmra.mxu3 %vm263_vm0, %v250_v14 }
  0x4f   : > { %1050 = vmatmul.msk.f32.gmra.mxu0 %vm263_vm0, %v233_v15  ;;  %1068 = vmatmul.msk.f32.gmra.mxu3 %vm263_vm0, %v251_v16 }
  0x57   : > { %1051 = vmatmul.msk.f32.gmra.mxu0 %vm263_vm0, %v234_v17  ;;  %1069 = vmatmul.msk.f32.gmra.mxu3 %vm263_vm0, %v252_v18 }
  0x5f   : > { %1052 = vmatmul.msk.f32.gmra.mxu0 %vm263_vm0, %v235_v22  ;;  %1070 = vmatmul.msk.f32.gmra.mxu3 %vm263_vm0, %v253_v23 }
  0x67   : > { %1053 = vmatmul.msk.f32.gmra.mxu0 %vm263_vm0, %v236_v28  ;;  %1071 = vmatmul.msk.f32.gmra.mxu3 %vm263_vm0, %v254_v29 }
  0x6f   : > { %1054 = vmatmul.msk.f32.gmra.mxu0 %vm263_vm0, %v237_v34  ;;  %1072 = vmatmul.msk.f32.gmra.mxu3 %vm263_vm0, %v255_v35 }
  0x77   : > { %1055 = vmatmul.msk.f32.gmra.mxu0 %vm263_vm0, %v238_v39  ;;  %1073 = vmatmul.msk.f32.gmra.mxu3 %vm263_vm0, %v256_v40 }
  0x7f   : > { %1056 = vmatmul.msk.f32.gmra.mxu0 %vm263_vm0, %v239_v43  ;;  %1074 = vmatmul.msk.f32.gmra.mxu3 %vm263_vm0, %v257_v44 }
  0x87   : > { %1057 = vmatmul.msk.f32.gmra.mxu0 %vm263_vm0, %v240_v45 }
  0x8f   : > { %1058 = vmatmul.msk.f32.gmra.mxu0 %vm263_vm0, %v241_v46 }
  0x94   : > { %v377_v48 = vpop.f32.mrf.mxu0 }
  0x95   : > { %v378_v50 = vadd.f32 %v1549_v47, %v377_v48 }
  0x97   : > { %v473_v51 = vmax.f32 %v378_v50, 0.0  ;;  %1059 = vmatmul.msk.f32.gmra.mxu0 %vm263_vm0, %v242_v49 }
  0x99   : > { %541 = vmatmul.f32.vlgmr.msra.gmra.mxu1 %v473_v51 }
  0x9a   : > { %v1554_v52 = vpop.f32.mrf.mxu3 }
  0x9c   : > { %v380_v53 = vpop.f32.mrf.mxu0 }
  0x9d   : > { %v381_v55 = vadd.f32 %v1549_v47, %v380_v53 }
  0x9f   : > { %v474_v56 = vmax.f32 %v381_v55, 0.0  ;;  %1060 = vmatmul.msk.f32.gmra.mxu0 %vm263_vm0, %v243_v54 }
  0xa1   : > { %544 = vmatmul.f32.gmra.mxu1 %v474_v56  ;;  %v1599_v56 = vld [vmem:[%s1997_s4] ss:$0 sm:$0xff] }
  0xa2   : > { %v1559_v57 = vpop.f32.mrf.mxu3 }
  0xa4   : > { %v383_v58 = vpop.f32.mrf.mxu0 }
  0xa5   : > { %v384_v59 = vadd.f32 %v1549_v47, %v383_v58 }
  0xa7   : > { %v475_v60 = vmax.f32 %v384_v59, 0.0 }
  0xa9   : > { %547 = vmatmul.f32.gmra.mxu1 %v475_v60 }
  0xaa   : > { %v1562_v61 = vpop.f32.mrf.mxu3 }
  0xac   : > { %v386_v62 = vpop.f32.mrf.mxu0 }
  0xad   : > { %v387_v63 = vadd.f32 %v1549_v47, %v386_v62 }
  0xaf   : > { %v476_v0 = vmax.f32 %v387_v63, 0.0 }
  0xb1   : > { %550 = vmatmul.f32.gmra.mxu1 %v476_v0 }
  0xb2   : > { %v1565_v1 = vpop.f32.mrf.mxu3 }
  0xb4   : > { %v389_v2 = vpop.f32.mrf.mxu0 }
  0xb5   : > { %v390_v3 = vadd.f32 %v1549_v47, %v389_v2 }
  0xb7   : > { %v477_v4 = vmax.f32 %v390_v3, 0.0 }
  0xb9   : > { %553 = vmatmul.f32.gmra.mxu1 %v477_v4 }
  0xba   : > { %v1568_v5 = vpop.f32.mrf.mxu3 }
  0xbc   : > { %v392_v6 = vpop.f32.mrf.mxu0 }
  0xbd   : > { %v393_v7 = vadd.f32 %v1549_v47, %v392_v6 }
  0xbf   : > { %v478_v8 = vmax.f32 %v393_v7, 0.0  ;;  %v432_v7 = vadd.f32 %v1549_v47, %v1554_v52  ;;  %v438_v52 = vadd.f32 %v1549_v47, %v1562_v61  ;;  %v444_v61 = vadd.f32 %v1549_v47, %v1568_v5 }
  0xc1   : > { %556 = vmatmul.f32.gmra.mxu1 %v478_v8 }
  0xc2   : > { %v1571_v9 = vpop.f32.mrf.mxu3 }
  0xc4   : > { %v395_v10 = vpop.f32.mrf.mxu0 }
  0xc5   : > { %v396_v11 = vadd.f32 %v1549_v47, %v395_v10  ;;  %v491_v10 = vmax.f32 %v432_v7, 0.0 }
  0xc7   : > { %v479_v12 = vmax.f32 %v396_v11, 0.0 }
  0xc9   : > { %559 = vmatmul.f32.gmra.mxu1 %v479_v12  ;;  %v435_v12 = vadd.f32 %v1549_v47, %v1559_v57  ;;  %v441_v57 = vadd.f32 %v1549_v47, %v1565_v1  ;;  %v447_v1 = vadd.f32 %v1549_v47, %v1571_v9 }
  0xca   : > { %v1574_v13 = vpop.f32.mrf.mxu3 }
  0xcb   : > { %v450_v5 = vadd.f32 %v1549_v47, %v1574_v13 }
  0xcc   : > { %v398_v14 = vpop.f32.mrf.mxu0 }
  0xcd   : > { %v399_v15 = vadd.f32 %v1549_v47, %v398_v14 }
  0xcf   : > { %v480_v16 = vmax.f32 %v399_v15, 0.0  ;;  %v492_v15 = vmax.f32 %v435_v12, 0.0 }
  0xd1   : > { %562 = vmatmul.f32.gmra.mxu1 %v480_v16 }
  0xd2   : > { %v1577_v17 = vpop.f32.mrf.mxu3 }
  0xd3   : > { %v453_v9 = vadd.f32 %v1549_v47, %v1577_v17 }
  0xd4   : > { %v401_v18 = vpop.f32.mrf.mxu0 }
  0xd5   : > { %v402_v19 = vadd.f32 %v1549_v47, %v401_v18 }
  0xd7   : > { %v481_v20 = vmax.f32 %v402_v19, 0.0  ;;  %v493_v19 = vmax.f32 %v438_v52, 0.0 }
  0xd9   : > { %565 = vmatmul.f32.gmra.mxu1 %v481_v20 }
  0xda   : > { %v1580_v21 = vpop.f32.mrf.mxu3 }
  0xdb   : > { %v456_v13 = vadd.f32 %v1549_v47, %v1580_v21 }
  0xdc   : > { %v404_v22 = vpop.f32.mrf.mxu0 }
  0xdd   : > { %v405_v23 = vadd.f32 %v1549_v47, %v404_v22 }
  0xdf   : > { %v482_v24 = vmax.f32 %v405_v23, 0.0  ;;  %v494_v23 = vmax.f32 %v441_v57, 0.0 }
  0xe1   : > { %568 = vmatmul.f32.gmra.mxu1 %v482_v24 }
  0xe2   : > { %v1583_v25 = vpop.f32.mrf.mxu3 }
  0xe3   : > { %v459_v17 = vadd.f32 %v1549_v47, %v1583_v25 }
  0xe4   : > { %v407_v26 = vpop.f32.mrf.mxu0 }
  0xe5   : > { %v408_v27 = vadd.f32 %v1549_v47, %v407_v26 }
  0xe7   : > { %v483_v28 = vmax.f32 %v408_v27, 0.0  ;;  %v495_v27 = vmax.f32 %v444_v61, 0.0 }
  0xe9   : > { %571 = vmatmul.f32.gmra.mxu1 %v483_v28 }
  0xea   : > { %v1586_v29 = vpop.f32.mrf.mxu3 }
  0xeb   : > { %v462_v21 = vadd.f32 %v1549_v47, %v1586_v29 }
  0xec   : > { %v410_v30 = vpop.f32.mrf.mxu0 }
  0xed   : > { %v411_v31 = vadd.f32 %v1549_v47, %v410_v30 }
  0xef   : > { %v484_v32 = vmax.f32 %v411_v31, 0.0  ;;  %v496_v31 = vmax.f32 %v447_v1, 0.0 }
  0xf1   : > { %574 = vmatmul.f32.gmra.mxu1 %v484_v32 }
  0xf2   : > { %v464_v33 = vpop.f32.mrf.mxu3 }
  0xf3   : > { %v465_v34 = vadd.f32 %v1549_v47, %v464_v33 }
  0xf4   : > { %v413_v35 = vpop.f32.mrf.mxu0 }
  0xf5   : > { %v502_v36 = vmax.f32 %v465_v34, 0.0  ;;  %v414_v37 = vadd.f32 %v1549_v47, %v413_v35  ;;  %v497_v34 = vmax.f32 %v450_v5, 0.0 }
  0xf7   : > { %v485_v38 = vmax.f32 %v414_v37, 0.0  ;;  %628 = vmatmul.f32.vlgmr.msrb.gmra.mxu3 %v502_v36  ;;  %v498_v37 = vmax.f32 %v453_v9, 0.0 }
  0xf9   : > { %577 = vmatmul.f32.gmra.mxu1 %v485_v38 }
  0xfa   : > { %v467_v39 = vpop.f32.mrf.mxu3 }
  0xfb   : > { %v468_v40 = vadd.f32 %v1549_v47, %v467_v39 }
  0xfc   : > { %v416_v41 = vpop.f32.mrf.mxu0 }
  0xfd   : > { %v503_v42 = vmax.f32 %v468_v40, 0.0  ;;  %v417_v43 = vadd.f32 %v1549_v47, %v416_v41  ;;  %v499_v40 = vmax.f32 %v456_v13, 0.0 }
  0xff   : > { %v486_v44 = vmax.f32 %v417_v43, 0.0  ;;  %631 = vmatmul.f32.gmra.mxu3 %v503_v42  ;;  %v500_v43 = vmax.f32 %v459_v17, 0.0 }
 0x101   : > { %580 = vmatmul.f32.gmra.mxu1 %v486_v44 }
 0x102   : > { %v470_v45 = vpop.f32.mrf.mxu3 }
 0x103   : > { %v471_v46 = vadd.f32 %v1549_v47, %v470_v45 }
 0x104   : > { %v419_v48 = vpop.f32.mrf.mxu0 }
 0x105   : > { %v504_v49 = vmax.f32 %v471_v46, 0.0  ;;  %v420_v50 = vadd.f32 %v1549_v47, %v419_v48  ;;  %v501_v46 = vmax.f32 %v462_v21, 0.0 }
 0x107   : > { %v487_v51 = vmax.f32 %v420_v50, 0.0  ;;  %634 = vmatmul.f32.gmra.mxu3 %v504_v49 }
 0x109   : > { %583 = vmatmul.f32.vlgmr.msra.gmra.mxu2 %v487_v51 }
 0x10c   : > { %v422_v53 = vpop.f32.mrf.mxu0 }
 0x10d   : > { %v423_v54 = vadd.f32 %v1549_v47, %v422_v53 }
 0x10f   : > { %v488_v55 = vmax.f32 %v423_v54, 0.0 }
 0x111   : > { %586 = vmatmul.f32.gmra.mxu2 %v488_v55 }
 0x114   : > { %v425_v58 = vpop.f32.mrf.mxu0 }
 0x115   : > { %v426_v59 = vadd.f32 %v1549_v47, %v425_v58 }
 0x116   : > { %v542_v60 = vpop.f32.mrf.mxu1 }
 0x117   : > { %v489_v62 = vmax.f32 %v426_v59, 0.0  ;;  %v1603_v63 = vadd.f32 %v1599_v56, %v542_v60 }
 0x119   : > { %589 = vmatmul.f32.gmra.mxu2 %v489_v62  ;;  %638 = vmax.xlane.f32.xlu0 %v1603_v63 }
 0x11c   : > { %v428_v0 = vpop.f32.mrf.mxu0 }
 0x11d   : > { %v429_v2 = vadd.f32 %v1549_v47, %v428_v0 }
 0x11e   : > { %v545_v3 = vpop.f32.mrf.mxu1 }
 0x11f   : > { %v490_v4 = vmax.f32 %v429_v2, 0.0  ;;  %v1608_v6 = vadd.f32 %v1599_v56, %v545_v3 }
 0x121   : > { %592 = vmatmul.f32.gmra.mxu2 %v490_v4  ;;  %640 = vmax.xlane.f32.xlu0 %v1608_v6 }
 0x126   : > { %v548_v8 = vpop.f32.mrf.mxu1 }
 0x127   : > { %v1614_v11 = vadd.f32 %v1599_v56, %v548_v8 }
 0x129   : > { %595 = vmatmul.f32.gmra.mxu2 %v491_v10  ;;  %642 = vmax.xlane.f32.xlu1 %v1614_v11 }
 0x12e   : > { %v551_v14 = vpop.f32.mrf.mxu1 }
 0x12f   : > { %v1620_v16 = vadd.f32 %v1599_v56, %v551_v14 }
 0x131   : > { %598 = vmatmul.f32.gmra.mxu2 %v492_v15  ;;  %644 = vmax.xlane.f32.xlu1 %v1620_v16 }
 0x136   : > { %v554_v18 = vpop.f32.mrf.mxu1 }
 0x137   : > { %v1626_v20 = vadd.f32 %v1599_v56, %v554_v18 }
 0x139   : > { %601 = vmatmul.f32.gmra.mxu2 %v493_v19  ;;  %646 = vmax.xlane.f32.xlu2 %v1626_v20 }
 0x13e   : > { %v557_v22 = vpop.f32.mrf.mxu1 }
 0x13f   : > { %v1632_v24 = vadd.f32 %v1599_v56, %v557_v22 }
 0x141   : > { %604 = vmatmul.f32.gmra.mxu2 %v494_v23  ;;  %648 = vmax.xlane.f32.xlu2 %v1632_v24 }
 0x146   : > { %v560_v26 = vpop.f32.mrf.mxu1 }
 0x147   : > { %v1638_v28 = vadd.f32 %v1599_v56, %v560_v26 }
 0x149   : > { %607 = vmatmul.f32.gmra.mxu2 %v495_v27  ;;  %650 = vmax.xlane.f32.xlu0 %v1638_v28 }
 0x14e   : > { %v563_v30 = vpop.f32.mrf.mxu1 }
 0x14f   : > { %v1644_v32 = vadd.f32 %v1599_v56, %v563_v30 }
 0x151   : > { %610 = vmatmul.f32.gmra.mxu2 %v496_v31  ;;  %652 = vmax.xlane.f32.xlu1 %v1644_v32 }
 0x156   : > { %v566_v33 = vpop.f32.mrf.mxu1 }
 0x157   : > { %v1650_v35 = vadd.f32 %v1599_v56, %v566_v33 }
 0x159   : > { %613 = vmatmul.f32.gmra.mxu2 %v497_v34  ;;  %654 = vmax.xlane.f32.xlu2 %v1650_v35 }
 0x15e   : > { %v569_v36 = vpop.f32.mrf.mxu1 }
 0x15f   : > { %v1656_v38 = vadd.f32 %v1599_v56, %v569_v36 }
 0x161   : > { %616 = vmatmul.f32.gmra.mxu2 %v498_v37  ;;  %656 = vmax.xlane.f32.xlu0 %v1656_v38 }
 0x166   : > { %v572_v39 = vpop.f32.mrf.mxu1 }
 0x167   : > { %v1662_v41 = vadd.f32 %v1599_v56, %v572_v39 }
 0x169   : > { %619 = vmatmul.f32.gmra.mxu2 %v499_v40  ;;  %658 = vmax.xlane.f32.xlu1 %v1662_v41 }
 0x16e   : > { %v575_v42 = vpop.f32.mrf.mxu1 }
 0x16f   : > { %v1668_v44 = vadd.f32 %v1599_v56, %v575_v42 }
 0x171   : > { %622 = vmatmul.f32.gmra.mxu2 %v500_v43  ;;  %660 = vmax.xlane.f32.xlu2 %v1668_v44 }
 0x176   : > { %v578_v45 = vpop.f32.mrf.mxu1 }
 0x177   : > { %v1674_v48 = vadd.f32 %v1599_v56, %v578_v45 }
 0x179   : > { %625 = vmatmul.f32.gmra.mxu2 %v501_v46  ;;  %662 = vmax.xlane.f32.xlu0 %v1674_v48 }
 0x17a   : > { %v629_v25 = vpop.f32.mrf.mxu3 }
 0x17b   : > { %v1678_v49 = vadd.f32 %v1599_v56, %v629_v25 }
 0x17d   : > { %696 = vmax.xlane.f32.xlu2 %v1678_v49 }
 0x17e   : > { %v581_v50 = vpop.f32.mrf.mxu1 }
 0x17f   : > { %v1682_v51 = vadd.f32 %v1599_v56, %v581_v50 }
 0x181   : > { %664 = vmax.xlane.f32.xlu1 %v1682_v51 }
 0x182   : > { %v632_v47 = vpop.f32.mrf.mxu3 }
 0x183   : > { %v1686_v29 = vadd.f32 %v1599_v56, %v632_v47 }
 0x185   : > { %698 = vmax.xlane.f32.xlu0 %v1686_v29 }
 0x18a   : > { %v635_v53 = vpop.f32.mrf.mxu3 }
 0x18b   : > { %v1690_v54 = vadd.f32 %v1599_v56, %v635_v53 }
 0x18c   : > { %v584_v55 = vpop.f32.mrf.mxu2  ;;  %v639_v58 = vpop.xlane.xlu0 %638 }
 0x18d   : > { %v1693_v59 = vadd.f32 %v1599_v56, %v584_v55  ;;  %v702_v60 = vsub.f32 %v1603_v63, %v639_v58  ;;  %700 = vmax.xlane.f32.xlu1 %v1690_v54 }
 0x18f   : > { %v734_v62 = vmul.f32 1.442695, %v702_v60  ;;  %666 = vmax.xlane.f32.xlu2 %v1693_v59 }
 0x191   : > { %1157 = vpow2.f32 %v734_v62 }
 0x194   : > { %v587_v0 = vpop.f32.mrf.mxu2  ;;  %v641_v2 = vpop.xlane.xlu0 %640 }
 0x195   : > { %v1699_v3 = vadd.f32 %v1599_v56, %v587_v0  ;;  %v703_v4 = vsub.f32 %v1608_v6, %v641_v2 }
 0x197   : > { %v1702_v7 = vpop.eup %1157  ;;  %v736_v8 = vmul.f32 1.442695, %v703_v4  ;;  %668 = vmax.xlane.f32.xlu0 %v1699_v3 }
 0x198   : > { %798 = vadd.xlane.f32.xlu2 %v1702_v7 }
 0x199   : > { %1159 = vpow2.f32 %v736_v8 }
 0x19c   : > { %v590_v63 = vpop.f32.mrf.mxu2  ;;  %v643_v10 = vpop.xlane.xlu1 %642 }
 0x19d   : > { %v1707_v12 = vadd.f32 %v1599_v56, %v590_v63  ;;  %v704_v14 = vsub.f32 %v1614_v11, %v643_v10 }
 0x19f   : > { %v1710_v15 = vpop.eup %1159  ;;  %v738_v52 = vmul.f32 1.442695, %v704_v14  ;;  %670 = vmax.xlane.f32.xlu1 %v1707_v12 }
 0x1a0   : > { %800 = vadd.xlane.f32.xlu0 %v1710_v15 }
 0x1a1   : > { %1161 = vpow2.f32 %v738_v52 }
 0x1a4   : > { %v593_v6 = vpop.f32.mrf.mxu2  ;;  %v645_v18 = vpop.xlane.xlu1 %644 }
 0x1a5   : > { %v1715_v19 = vadd.f32 %v1599_v56, %v593_v6  ;;  %v705_v57 = vsub.f32 %v1620_v16, %v645_v18 }
 0x1a7   : > { %v1718_v22 = vpop.eup %1161  ;;  %v740_v23 = vmul.f32 1.442695, %v705_v57  ;;  %672 = vmax.xlane.f32.xlu2 %v1715_v19 }
 0x1a8   : > { %802 = vadd.xlane.f32.xlu1 %v1718_v22 }
 0x1a9   : > { %1163 = vpow2.f32 %v740_v23 }
 0x1ac   : > { %v596_v11 = vpop.f32.mrf.mxu2  ;;  %v647_v61 = vpop.xlane.xlu2 %646 }
 0x1ad   : > { %v1723_v26 = vadd.f32 %v1599_v56, %v596_v11  ;;  %v706_v27 = vsub.f32 %v1626_v20, %v647_v61 }
 0x1af   : > { %v1726_v1 = vpop.eup %1163  ;;  %v742_v30 = vmul.f32 1.442695, %v706_v27  ;;  %674 = vmax.xlane.f32.xlu0 %v1723_v26 }
 0x1b0   : > { %804 = vadd.xlane.f32.xlu2 %v1726_v1 }
 0x1b1   : > { %1165 = vpow2.f32 %v742_v30 }
 0x1b4   : > { %v599_v16 = vpop.f32.mrf.mxu2  ;;  %v649_v31 = vpop.xlane.xlu2 %648 }
 0x1b5   : > { %v1731_v5 = vadd.f32 %v1599_v56, %v599_v16  ;;  %v707_v33 = vsub.f32 %v1632_v24, %v649_v31 }
 0x1b7   : > { %v1734_v34 = vpop.eup %1165  ;;  %v744_v9 = vmul.f32 1.442695, %v707_v33  ;;  %676 = vmax.xlane.f32.xlu1 %v1731_v5 }
 0x1b8   : > { %806 = vadd.xlane.f32.xlu0 %v1734_v34 }
 0x1b9   : > { %1167 = vpow2.f32 %v744_v9 }
 0x1bc   : > { %v602_v20 = vpop.f32.mrf.mxu2  ;;  %v651_v36 = vpop.xlane.xlu0 %650 }
 0x1bd   : > { %v1739_v37 = vadd.f32 %v1599_v56, %v602_v20  ;;  %v708_v13 = vsub.f32 %v1638_v28, %v651_v36 }
 0x1bf   : > { %v1742_v39 = vpop.eup %1167  ;;  %v746_v40 = vmul.f32 1.442695, %v708_v13  ;;  %678 = vmax.xlane.f32.xlu2 %v1739_v37 }
 0x1c0   : > { %808 = vadd.xlane.f32.xlu1 %v1742_v39 }
 0x1c1   : > { %1169 = vpow2.f32 %v746_v40 }
 0x1c4   : > { %v605_v24 = vpop.f32.mrf.mxu2  ;;  %v653_v17 = vpop.xlane.xlu1 %652 }
 0x1c5   : > { %v1747_v42 = vadd.f32 %v1599_v56, %v605_v24  ;;  %v709_v43 = vsub.f32 %v1644_v32, %v653_v17 }
 0x1c7   : > { %v1750_v21 = vpop.eup %1169  ;;  %v748_v45 = vmul.f32 1.442695, %v709_v43  ;;  %680 = vmax.xlane.f32.xlu0 %v1747_v42 }
 0x1c8   : > { %810 = vadd.xlane.f32.xlu2 %v1750_v21 }
 0x1c9   : > { %1171 = vpow2.f32 %v748_v45 }
 0x1cc   : > { %v608_v28 = vpop.f32.mrf.mxu2  ;;  %v655_v46 = vpop.xlane.xlu2 %654 }
 0x1cd   : > { %v1755_v25 = vadd.f32 %v1599_v56, %v608_v28  ;;  %v710_v50 = vsub.f32 %v1650_v35, %v655_v46 }
 0x1cf   : > { %v1758_v47 = vpop.eup %1171  ;;  %v750_v53 = vmul.f32 1.442695, %v710_v50  ;;  %682 = vmax.xlane.f32.xlu1 %v1755_v25 }
 0x1d0   : > { %812 = vadd.xlane.f32.xlu0 %v1758_v47 }
 0x1d1   : > { %1173 = vpow2.f32 %v750_v53 }
 0x1d4   : > { %v611_v32 = vpop.f32.mrf.mxu2  ;;  %v657_v55 = vpop.xlane.xlu0 %656 }
 0x1d5   : > { %v1763_v58 = vadd.f32 %v1599_v56, %v611_v32  ;;  %v711_v60 = vsub.f32 %v1656_v38, %v657_v55 }
 0x1d7   : > { %v1766_v62 = vpop.eup %1173  ;;  %v752_v0 = vmul.f32 1.442695, %v711_v60  ;;  %684 = vmax.xlane.f32.xlu2 %v1763_v58 }
 0x1d8   : > { %814 = vadd.xlane.f32.xlu1 %v1766_v62 }
 0x1d9   : > { %1175 = vpow2.f32 %v752_v0 }
 0x1dc   : > { %v614_v35 = vpop.f32.mrf.mxu2  ;;  %v659_v2 = vpop.xlane.xlu1 %658 }
 0x1dd   : > { %v1771_v4 = vadd.f32 %v1599_v56, %v614_v35  ;;  %v712_v8 = vsub.f32 %v1662_v41, %v659_v2 }
 0x1df   : > { %v1774_v63 = vpop.eup %1175  ;;  %v754_v10 = vmul.f32 1.442695, %v712_v8  ;;  %686 = vmax.xlane.f32.xlu0 %v1771_v4 }
 0x1e0   : > { %816 = vadd.xlane.f32.xlu2 %v1774_v63 }
 0x1e1   : > { %1177 = vpow2.f32 %v754_v10 }
 0x1e4   : > { %v617_v38 = vpop.f32.mrf.mxu2  ;;  %v661_v11 = vpop.xlane.xlu2 %660 }
 0x1e5   : > { %v1779_v14 = vadd.f32 %v1599_v56, %v617_v38  ;;  %v713_v9 = vsub.f32 %v1668_v44, %v661_v11 }
 0x1e7   : > { %v1781_v52 = vpop.eup %1177  ;;  %688 = vmax.xlane.f32.xlu1 %v1779_v14  ;;  %v756_v20 = vmul.f32 1.442695, %v713_v9 }
 0x1e8   : > { %818 = vadd.xlane.f32.xlu0 %v1781_v52 }
 0x1ec   : > { %v620_v6 = vpop.f32.mrf.mxu2  ;;  %v663_v41 = vpop.xlane.xlu0 %662 }
 0x1ed   : > { %v1786_v18 = vadd.f32 %v1599_v56, %v620_v6  ;;  %v714_v57 = vsub.f32 %v1674_v48, %v663_v41 }
 0x1ef   : > { %v758_v23 = vmul.f32 1.442695, %v714_v57  ;;  %690 = vmax.xlane.f32.xlu2 %v1786_v18 }
 0x1f0   : > { %v1799_v48 = vpop.xlane.xlu2 %696 }
 0x1f1   : > { %1179 = vpow2.f32 %v758_v23 }
 0x1f4   : > { %v623_v61 = vpop.f32.mrf.mxu2  ;;  %v665_v27 = vpop.xlane.xlu1 %664 }
 0x1f5   : > { %v1791_v30 = vadd.f32 %v1599_v56, %v623_v61  ;;  %v715_v16 = vsub.f32 %v1682_v51, %v665_v27 }
 0x1f7   : > { %v1794_v31 = vpop.eup %1179  ;;  %v760_v33 = vmul.f32 1.442695, %v715_v16  ;;  %692 = vmax.xlane.f32.xlu0 %v1791_v30 }
 0x1f8   : > { %822 = vadd.xlane.f32.xlu2 %v1794_v31  ;;  %v1808_v51 = vpop.xlane.xlu0 %698 }
 0x1f9   : > { %1181 = vpow2.f32 %v760_v33 }
 0x1fa   : > { %1183 = vpow2.f32 %v756_v20 }
 0x1fc   : > { %v626_v36 = vpop.f32.mrf.mxu2 }
 0x1fd   : > { %v1802_v13 = vadd.f32 %v1599_v56, %v626_v36 }
 0x1ff   : > { %v1804_v40 = vpop.eup %1181  ;;  %694 = vmax.xlane.f32.xlu1 %v1802_v13 }
 0x200   : > { %824 = vadd.xlane.f32.xlu0 %v1804_v40  ;;  %v1811_v43 = vpop.eup %1183  ;;  %v1814_v56 = vpop.xlane.xlu1 %700 }
 0x202   : > { %v667_v44 = vpop.xlane.xlu2 %666 }
 0x203   : > { %v716_v24 = vsub.f32 %v1693_v59, %v667_v44 }
 0x205   : > { %v762_v17 = vmul.f32 1.442695, %v716_v24 }
 0x207   : > { %1185 = vpow2.f32 %v762_v17  ;;  %820 = vadd.xlane.f32.xlu1 %v1811_v43 }
 0x20a   : > { %v669_v45 = vpop.xlane.xlu0 %668 }
 0x20b   : > { %v717_v28 = vsub.f32 %v1699_v3, %v669_v45  ;;  %v799_v46 = vpop.xlane.xlu2 %798 }
 0x20c   : > { %1187 = vrcp.f32 %v799_v46 }
 0x20d   : > { %v1818_v50 = vpop.eup %1185  ;;  %v764_v53 = vmul.f32 1.442695, %v717_v28 }
 0x20f   : > { %1189 = vpow2.f32 %v764_v53  ;;  %826 = vadd.xlane.f32.xlu1 %v1818_v50 }
 0x212   : > { %v1188_v59 = vpop.eup %1187  ;;  %v671_v32 = vpop.xlane.xlu1 %670 }
 0x213   : > { %v894_v55 = vmul.f32 %v1188_v59, %v1702_v7  ;;  %v718_v60 = vsub.f32 %v1707_v12, %v671_v32  ;;  %v801_v0 = vpop.xlane.xlu0 %800 }
 0x214   : > { %1191 = vrcp.f32 %v801_v0 }
 0x215   : > { %v1825_v3 = vpop.eup %1189  ;;  %926 = vst [vmem:[%s1827_s25] sm:$0xff] %v894_v55  ;;  %v766_v35 = vmul.f32 1.442695, %v718_v60 }
 0x216   : > { %828 = vadd.xlane.f32.xlu2 %v1825_v3 }
 0x217   : > { %1193 = vpow2.f32 %v766_v35 }
 0x21a   : > { %v1192_v2 = vpop.eup %1191  ;;  %v673_v8 = vpop.xlane.xlu2 %672 }
 0x21b   : > { %v895_v10 = vmul.f32 %v1192_v2, %v1710_v15  ;;  %v719_v7 = vsub.f32 %v1715_v19, %v673_v8  ;;  %v803_v12 = vpop.xlane.xlu1 %802 }
 0x21c   : > { %1195 = vrcp.f32 %v803_v12 }
 0x21d   : > { %v1833_v38 = vpop.eup %1193  ;;  %927 = vst [vmem:[%s1827_s25 + $0x8] sm:$0xff] %v895_v10  ;;  %v768_v6 = vmul.f32 1.442695, %v719_v7 }
 0x21e   : > { %830 = vadd.xlane.f32.xlu0 %v1833_v38 }
 0x21f   : > { %1197 = vpow2.f32 %v768_v6 }
 0x222   : > { %v1196_v41 = vpop.eup %1195  ;;  %v675_v57 = vpop.xlane.xlu0 %674 }
 0x223   : > { %v896_v23 = vmul.f32 %v1196_v41, %v1718_v22  ;;  %v720_v11 = vsub.f32 %v1723_v26, %v675_v57  ;;  %v805_v15 = vpop.xlane.xlu2 %804 }
 0x224   : > { %1199 = vrcp.f32 %v805_v15 }
 0x225   : > { %v1839_v61 = vpop.eup %1197  ;;  %928 = vst [vmem:[%s1827_s25 + $0x10] sm:$0xff] %v896_v23  ;;  %v770_v19 = vmul.f32 1.442695, %v720_v11 }
 0x226   : > { %832 = vadd.xlane.f32.xlu1 %v1839_v61 }
 0x227   : > { %1201 = vpow2.f32 %v770_v19 }
 0x22a   : > { %v1200_v27 = vpop.eup %1199  ;;  %v677_v16 = vpop.xlane.xlu1 %676 }
 0x22b   : > { %v897_v33 = vmul.f32 %v1200_v27, %v1726_v1  ;;  %v721_v9 = vsub.f32 %v1731_v5, %v677_v16  ;;  %v807_v22 = vpop.xlane.xlu0 %806 }
 0x22c   : > { %1203 = vrcp.f32 %v807_v22 }
 0x22d   : > { %v1845_v20 = vpop.eup %1201  ;;  %929 = vst [vmem:[%s1827_s25 + $0x18] sm:$0xff] %v897_v33  ;;  %v772_v26 = vmul.f32 1.442695, %v721_v9 }
 0x22e   : > { %834 = vadd.xlane.f32.xlu2 %v1845_v20 }
 0x22f   : > { %1205 = vpow2.f32 %v772_v26 }
 0x232   : > { %v1204_v36 = vpop.eup %1203  ;;  %v679_v44 = vpop.xlane.xlu2 %678 }
 0x233   : > { %v898_v24 = vmul.f32 %v1204_v36, %v1734_v34  ;;  %v722_v17 = vsub.f32 %v1739_v37, %v679_v44  ;;  %v809_v1 = vpop.xlane.xlu1 %808 }
 0x234   : > { %1207 = vrcp.f32 %v809_v1 }
 0x235   : > { %v1851_v45 = vpop.eup %1205  ;;  %930 = vst [vmem:[%s1827_s25 + $0x20] sm:$0xff] %v898_v24  ;;  %v774_v5 = vmul.f32 1.442695, %v722_v17 }
 0x236   : > { %836 = vadd.xlane.f32.xlu0 %v1851_v45 }
 0x237   : > { %1209 = vpow2.f32 %v774_v5 }
 0x23a   : > { %v1208_v28 = vpop.eup %1207  ;;  %v681_v46 = vpop.xlane.xlu0 %680 }
 0x23b   : > { %v899_v53 = vmul.f32 %v1208_v28, %v1742_v39  ;;  %v723_v59 = vsub.f32 %v1747_v42, %v681_v46  ;;  %v811_v34 = vpop.xlane.xlu2 %810  ;;  %v732_v46 = vsub.f32 %v1686_v29, %v1808_v51  ;;  %v733_v29 = vsub.f32 %v1690_v54, %v1814_v56 }
 0x23c   : > { %1211 = vrcp.f32 %v811_v34 }
 0x23d   : > { %v1857_v32 = vpop.eup %1209  ;;  %931 = vst [vmem:[%s1827_s25 + $0x28] sm:$0xff] %v899_v53  ;;  %v776_v37 = vmul.f32 1.442695, %v723_v59  ;;  %v796_v51 = vmul.f32 1.442695, %v733_v29 }
 0x23e   : > { %838 = vadd.xlane.f32.xlu1 %v1857_v32 }
 0x23f   : > { %1213 = vpow2.f32 %v776_v37 }
 0x242   : > { %v1212_v55 = vpop.eup %1211  ;;  %v683_v60 = vpop.xlane.xlu1 %682 }
 0x243   : > { %v900_v0 = vmul.f32 %v1212_v55, %v1750_v21  ;;  %v724_v35 = vsub.f32 %v1755_v25, %v683_v60  ;;  %v813_v39 = vpop.xlane.xlu0 %812 }
 0x244   : > { %1215 = vrcp.f32 %v813_v39 }
 0x245   : > { %v1863_v2 = vpop.eup %1213  ;;  %932 = vst [vmem:[%s1827_s25 + $0x30] sm:$0xff] %v900_v0  ;;  %v778_v42 = vmul.f32 1.442695, %v724_v35 }
 0x246   : > { %840 = vadd.xlane.f32.xlu2 %v1863_v2 }
 0x247   : > { %1217 = vpow2.f32 %v778_v42 }
 0x24a   : > { %v1216_v8 = vpop.eup %1215  ;;  %v685_v10 = vpop.xlane.xlu2 %684 }
 0x24b   : > { %v901_v7 = vmul.f32 %v1216_v8, %v1758_v47  ;;  %v725_v12 = vsub.f32 %v1763_v58, %v685_v10  ;;  %v815_v21 = vpop.xlane.xlu1 %814 }
 0x24c   : > { %1219 = vrcp.f32 %v815_v21 }
 0x24d   : > { %v1869_v6 = vpop.eup %1217  ;;  %933 = vst [vmem:[%s1827_s25 + $0x38] sm:$0xff] %v901_v7  ;;  %v780_v25 = vmul.f32 1.442695, %v725_v12 }
 0x24e   : > { %842 = vadd.xlane.f32.xlu0 %v1869_v6 }
 0x24f   : > { %1221 = vpow2.f32 %v780_v25 }
 0x252   : > { %v1220_v41 = vpop.eup %1219  ;;  %v687_v57 = vpop.xlane.xlu0 %686 }
 0x253   : > { %v902_v23 = vmul.f32 %v1220_v41, %v1766_v62  ;;  %v726_v11 = vsub.f32 %v1771_v4, %v687_v57  ;;  %v817_v47 = vpop.xlane.xlu2 %816 }
 0x254   : > { %1223 = vrcp.f32 %v817_v47 }
 0x255   : > { %v1875_v15 = vpop.eup %1221  ;;  %934 = vst [vmem:[%s1827_s25 + $0x40] sm:$0xff] %v902_v23  ;;  %v782_v58 = vmul.f32 1.442695, %v726_v11 }
 0x256   : > { %844 = vadd.xlane.f32.xlu1 %v1875_v15 }
 0x257   : > { %1225 = vpow2.f32 %v782_v58 }
 0x25a   : > { %v1224_v19 = vpop.eup %1223  ;;  %v689_v27 = vpop.xlane.xlu1 %688 }
 0x25b   : > { %v903_v16 = vmul.f32 %v1224_v19, %v1774_v63  ;;  %v727_v33 = vsub.f32 %v1779_v14, %v689_v27  ;;  %v819_v62 = vpop.xlane.xlu0 %818  ;;  %v731_v14 = vsub.f32 %v1678_v49, %v1799_v48  ;;  %v794_v48 = vmul.f32 1.442695, %v732_v46 }
 0x25c   : > { %1227 = vrcp.f32 %v819_v62 }
 0x25d   : > { %v1881_v9 = vpop.eup %1225  ;;  %935 = vst [vmem:[%s1827_s25 + $0x48] sm:$0xff] %v903_v16  ;;  %v784_v4 = vmul.f32 1.442695, %v727_v33  ;;  %v792_v17 = vmul.f32 1.442695, %v731_v14 }
 0x25e   : > { %846 = vadd.xlane.f32.xlu2 %v1881_v9 }
 0x25f   : > { %1229 = vpow2.f32 %v784_v4 }
 0x262   : > { %v1228_v22 = vpop.eup %1227  ;;  %v691_v26 = vpop.xlane.xlu2 %690 }
 0x263   : > { %v904_v36 = vmul.f32 %v1228_v22, %v1781_v52  ;;  %v728_v44 = vsub.f32 %v1786_v18, %v691_v26 }
 0x265   : > { %v1887_v24 = vpop.eup %1229  ;;  %936 = vst [vmem:[%s1827_s25 + $0x50] sm:$0xff] %v904_v36  ;;  %v786_v63 = vmul.f32 1.442695, %v728_v44 }
 0x266   : > { %848 = vadd.xlane.f32.xlu0 %v1887_v24 }
 0x267   : > { %1231 = vpow2.f32 %v786_v63 }
 0x26a   : > { %v693_v1 = vpop.xlane.xlu0 %692 }
 0x26b   : > { %v729_v5 = vsub.f32 %v1791_v30, %v693_v1  ;;  %v823_v28 = vpop.xlane.xlu2 %822 }
 0x26c   : > { %1233 = vrcp.f32 %v823_v28 }
 0x26d   : > { %v1894_v52 = vpop.eup %1231  ;;  %v788_v18 = vmul.f32 1.442695, %v729_v5  ;;  %1235 = vpow2.f32 %v792_v17 }
 0x26e   : > { %850 = vadd.xlane.f32.xlu1 %v1894_v52 }
 0x26f   : > { %1237 = vpow2.f32 %v788_v18 }
 0x272   : > { %v1234_v49 = vpop.eup %1233  ;;  %v695_v53 = vpop.xlane.xlu1 %694 }
 0x273   : > { %v906_v59 = vmul.f32 %v1234_v49, %v1794_v31  ;;  %v730_v30 = vsub.f32 %v1802_v13, %v695_v53  ;;  %v825_v34 = vpop.xlane.xlu0 %824  ;;  %v1901_v37 = vpop.eup %1235 }
 0x274   : > { %1239 = vrcp.f32 %v825_v34 }
 0x275   : > { %v1903_v55 = vpop.eup %1237  ;;  %938 = vst [vmem:[%s1827_s25 + $0x60] sm:$0xff] %v906_v59  ;;  %v790_v60 = vmul.f32 1.442695, %v730_v30  ;;  %1241 = vpow2.f32 %v794_v48 }
 0x276   : > { %856 = vadd.xlane.f32.xlu1 %v1901_v37  ;;  %852 = vadd.xlane.f32.xlu2 %v1903_v55 }
 0x277   : > { %1243 = vpow2.f32 %v790_v60 }
 0x27a   : > { %v1240_v31 = vpop.eup %1239  ;;  %v821_v13 = vpop.xlane.xlu1 %820 }
 0x27b   : > { %v907_v0 = vmul.f32 %v1240_v31, %v1804_v40  ;;  %1245 = vrcp.f32 %v821_v13  ;;  %v1911_v35 = vpop.eup %1241 }
 0x27c   : > { %1247 = vpow2.f32 %v796_v51 }
 0x27d   : > { %v1913_v39 = vpop.eup %1243  ;;  %939 = vst [vmem:[%s1827_s25 + $0x68] sm:$0xff] %v907_v0 }
 0x27e   : > { %854 = vadd.xlane.f32.xlu0 %v1913_v39  ;;  %858 = vadd.xlane.f32.xlu2 %v1911_v35 }
 0x281   : > { %v1246_v54 = vpop.eup %1245 }
 0x282   : > { %v905_v56 = vmul.f32 %v1246_v54, %v1811_v43  ;;  %v827_v42 = vpop.xlane.xlu1 %826  ;;  %v1920_v40 = vpop.eup %1247 }
 0x283   : > { %1249 = vrcp.f32 %v827_v42 }
 0x284   : > { %937 = vst [vmem:[%s1827_s25 + $0x58] sm:$0xff] %v905_v56 }
 0x286   : > { %860 = vadd.xlane.f32.xlu0 %v1920_v40 }
 0x289   : > { %v1250_v8 = vpop.eup %1249  ;;  %v829_v10 = vpop.xlane.xlu2 %828 }
 0x28a   : > { %v908_v7 = vmul.f32 %v1250_v8, %v1818_v50  ;;  %1251 = vrcp.f32 %v829_v10 }
 0x28c   : > { %940 = vst [vmem:[%s1827_s25 + $0x70] sm:$0xff] %v908_v7 }
 0x290   : > { %v1252_v12 = vpop.eup %1251 }
 0x291   : > { %v909_v21 = vmul.f32 %v1252_v12, %v1825_v3  ;;  %v831_v25 = vpop.xlane.xlu0 %830 }
 0x292   : > { %1253 = vrcp.f32 %v831_v25 }
 0x293   : > { %941 = vst [vmem:[%s1827_s25 + $0x78] sm:$0xff] %v909_v21 }
 0x298   : > { %v1254_v43 = vpop.eup %1253 }
 0x299   : > { %v910_v41 = vmul.f32 %v1254_v43, %v1833_v38  ;;  %v833_v57 = vpop.xlane.xlu1 %832 }
 0x29a   : > { %1255 = vrcp.f32 %v833_v57 }
 0x29b   : > { %942 = vst [vmem:[%s1827_s25 + $0x80] sm:$0xff] %v910_v41 }
 0x2a0   : > { %v1256_v23 = vpop.eup %1255 }
 0x2a1   : > { %v911_v50 = vmul.f32 %v1256_v23, %v1839_v61  ;;  %v835_v11 = vpop.xlane.xlu2 %834 }
 0x2a2   : > { %1257 = vrcp.f32 %v835_v11 }
 0x2a3   : > { %943 = vst [vmem:[%s1827_s25 + $0x88] sm:$0xff] %v911_v50 }
 0x2a8   : > { %v1258_v47 = vpop.eup %1257 }
 0x2a9   : > { %v912_v3 = vmul.f32 %v1258_v47, %v1845_v20  ;;  %v837_v58 = vpop.xlane.xlu0 %836 }
 0x2aa   : > { %1259 = vrcp.f32 %v837_v58 }
 0x2ab   : > { %944 = vst [vmem:[%s1827_s25 + $0x90] sm:$0xff] %v912_v3 }
 0x2b0   : > { %v1260_v19 = vpop.eup %1259 }
 0x2b1   : > { %v913_v38 = vmul.f32 %v1260_v19, %v1851_v45  ;;  %v839_v27 = vpop.xlane.xlu1 %838 }
 0x2b2   : > { %1261 = vrcp.f32 %v839_v27 }
 0x2b3   : > { %945 = vst [vmem:[%s1827_s25 + $0x98] sm:$0xff] %v913_v38 }
 0x2b8   : > { %v1262_v16 = vpop.eup %1261 }
 0x2b9   : > { %v914_v61 = vmul.f32 %v1262_v16, %v1857_v32  ;;  %v841_v33 = vpop.xlane.xlu2 %840 }
 0x2ba   : > { %1263 = vrcp.f32 %v841_v33 }
 0x2bb   : > { %946 = vst [vmem:[%s1827_s25 + $0xa0] sm:$0xff] %v914_v61 }
 0x2c0   : > { %v1264_v62 = vpop.eup %1263 }
 0x2c1   : > { %v915_v20 = vmul.f32 %v1264_v62, %v1863_v2  ;;  %v843_v4 = vpop.xlane.xlu0 %842 }
 0x2c2   : > { %1265 = vrcp.f32 %v843_v4 }
 0x2c3   : > { %947 = vst [vmem:[%s1827_s25 + $0xa8] sm:$0xff] %v915_v20 }
 0x2c8   : > { %v1266_v22 = vpop.eup %1265 }
 0x2c9   : > { %v916_v45 = vmul.f32 %v1266_v22, %v1869_v6  ;;  %v845_v26 = vpop.xlane.xlu1 %844 }
 0x2ca   : > { %1267 = vrcp.f32 %v845_v26 }
 0x2cb   : > { %948 = vst [vmem:[%s1827_s25 + $0xb0] sm:$0xff] %v916_v45 }
 0x2d0   : > { %v1268_v36 = vpop.eup %1267 }
 0x2d1   : > { %v917_v32 = vmul.f32 %v1268_v36, %v1875_v15  ;;  %v847_v44 = vpop.xlane.xlu2 %846 }
 0x2d2   : > { %1269 = vrcp.f32 %v847_v44 }
 0x2d3   : > { %949 = vst [vmem:[%s1827_s25 + $0xb8] sm:$0xff] %v917_v32 }
 0x2d8   : > { %v1270_v63 = vpop.eup %1269 }
 0x2d9   : > { %v918_v2 = vmul.f32 %v1270_v63, %v1881_v9  ;;  %v849_v14 = vpop.xlane.xlu0 %848 }
 0x2da   : > { %1271 = vrcp.f32 %v849_v14 }
 0x2db   : > { %950 = vst [vmem:[%s1827_s25 + $0xc0] sm:$0xff] %v918_v2 }
 0x2e0   : > { %v1272_v17 = vpop.eup %1271 }
 0x2e1   : > { %v919_v6 = vmul.f32 %v1272_v17, %v1887_v24  ;;  %v851_v1 = vpop.xlane.xlu1 %850 }
 0x2e2   : > { %1273 = vrcp.f32 %v851_v1 }
 0x2e3   : > { %951 = vst [vmem:[%s1827_s25 + $0xc8] sm:$0xff] %v919_v6 }
 0x2e8   : > { %v1274_v5 = vpop.eup %1273 }
 0x2e9   : > { %v920_v15 = vmul.f32 %v1274_v5, %v1894_v52  ;;  %v857_v28 = vpop.xlane.xlu1 %856  ;;  %v853_v18 = vpop.xlane.xlu2 %852 }
 0x2ea   : > { %1275 = vrcp.f32 %v857_v28 }
 0x2eb   : > { %952 = vst [vmem:[%s1827_s25 + $0xd0] sm:$0xff] %v920_v15  ;;  %1277 = vrcp.f32 %v853_v18 }
 0x2f0   : > { %v1276_v9 = vpop.eup %1275 }
 0x2f1   : > { %v1278_v46 = vpop.eup %1277  ;;  %v923_v49 = vmul.f32 %v1276_v9, %v1901_v37  ;;  %v859_v24 = vpop.xlane.xlu2 %858 }
 0x2f2   : > { %v855_v48 = vpop.xlane.xlu0 %854  ;;  %v921_v53 = vmul.f32 %v1278_v46, %v1903_v55  ;;  %1279 = vrcp.f32 %v859_v24 }
 0x2f3   : > { %955 = vst [vmem:[%s1827_s25 + $0xe8] sm:$0xff] %v923_v49  ;;  %1281 = vrcp.f32 %v855_v48 }
 0x2f4   : > { %953 = vst [vmem:[%s1827_s25 + $0xd8] sm:$0xff] %v921_v53 }
 0x2f8   : > { %v1280_v52 = vpop.eup %1279 }
 0x2f9   : > { %v1282_v59 = vpop.eup %1281  ;;  %v924_v30 = vmul.f32 %v1280_v52, %v1911_v35 }
 0x2fa   : > { %v861_v34 = vpop.xlane.xlu0 %860  ;;  %v922_v37 = vmul.f32 %v1282_v59, %v1913_v39 }
 0x2fb   : > { %1283 = vrcp.f32 %v861_v34  ;;  %956 = vst [vmem:[%s1827_s25 + $0xf0] sm:$0xff] %v924_v30 }
 0x2fc   : > { %954 = vst [vmem:[%s1827_s25 + $0xe0] sm:$0xff] %v922_v37 }
 0x301   : > { %v1284_v55 = vpop.eup %1283 }
 0x302   : > { %v925_v60 = vmul.f32 %v1284_v55, %v1920_v40 }
 0x304   : > { %957 = vst [vmem:[%s1827_s25 + $0xf8] sm:$0xff] %v925_v60 }
 0x305   : > { %1312 = shalt.err (!%p1309_p3)
}
 0x306   : > { %s1349_s17 = smov 128   ;;  %s1350_s23 = smov 8  }
 0x307   : > { %1114 = dma.vmem_to_hbm [thread:$0]  (%p1419_p5), %s972_s8, 4096, %s974_s9, %s959_s22, %s1349_s17, %s1349_s17, %s1350_s23  }
 0x308 PF: > { %p1120_p4 = scmp.ge.s32.totalorder %s1347_s21, 2  ;;  %s988_s25 = sand.u32 1, %s1335_s18  }
 0x309   : > { %s989_s26 = scalar_lea.sflag [#allocation3], %s988_s25 }
 0x30a   : > { %p1117_p7 = pnand %p1120_p4, %p1423_p6 }
 0x30c   : > { %p1118_p8 = pneg %p1117_p7 }
 0x30e   : > { %1330 = dma.done.wait (%p1118_p8), %s989_s26, 4096  }
 0x30f   : > { %1332 = vsyncadd (%p1118_p8), %s989_s26, 4294963200  ;;  %p15_p9 = scmp.ge.s32.totalorder %s1406_s24, 6   ;;  %s2001_s18 = smov %s1339_s19 }
 0x310   : > { %s2002_s19 = smov %s1343_s20  ;;  %s2003_s20 = smov %s1417_s27 }
 0x311   : > { %s2004_s21 = smov %s1406_s24  ;;  %17 = sbr.rel (!%p15_p9) target bundleno = 3 (0x3), region = 75 }
 0x316   :  { %995 = vsyncpa [#allocation3], 1 }
 0x317   :  { %997 = vsyncpa [#allocation3 + $0x1], 1 }

</bundles_post_ra>
